<compile_context>
chip_gen: v5e
topology: v5e:2x2
jax: 0.10.0
libtpu: 0.0.40
codegen_flags: <defaults>
</compile_context>

<pallas_src>
import functools

import jax
import jax.numpy as jnp
from jax.experimental import pallas as pl
from jax.experimental.pallas import tpu as pltpu


def _lstm_recurrence_kernel(gx_ref, whh_ref, h_out_ref, h_scr, c_scr, *,
                            hidden, t_chunk):
    """One grid step = T_CHUNK timesteps of the LSTM recurrence.

    gx_ref:      (T_CHUNK, B, 4H)  precomputed x_t @ W_ih^T + (b_ih + b_hh)
    whh_ref:     (H, 4H)           recurrent weight, transposed
    h_out_ref:   (T_CHUNK, B, H)   per-timestep hidden states
    h_scr/c_scr: (B, H) VMEM       recurrent state carried across grid steps
    """
    # Initialize recurrent state once, at the first chunk.
    @pl.when(pl.program_id(0) == 0)
    def _():
        h_scr[...] = jnp.zeros_like(h_scr)
        c_scr[...] = jnp.zeros_like(c_scr)

    whh = whh_ref[...]          # hoisted out of the timestep loop
    H = hidden

    def step(i, carry):
        h_prev, c_prev = carry
        # gates: (B, 4H) = precomputed input part + recurrent matmul
        gates = gx_ref[i] + jnp.dot(h_prev, whh,
                                    preferred_element_type=jnp.float32)
        # NOTE: for production sizes keep H a multiple of 128 so these gate
        # slices are whole-vreg / lane-aligned; at H=32 they are sub-vreg slices.
        i_g = jax.nn.sigmoid(gates[:, 0 * H:1 * H])
        f_g = jax.nn.sigmoid(gates[:, 1 * H:2 * H])
        g_g = jnp.tanh(gates[:, 2 * H:3 * H])
        o_g = jax.nn.sigmoid(gates[:, 3 * H:4 * H])
        c_new = f_g * c_prev + i_g * g_g
        h_new = o_g * jnp.tanh(c_new)
        h_out_ref[i] = h_new            # lane-width H store (not O)
        return (h_new, c_new)

    # Keep h/c in vregs across the chunk; unrolled so the scheduler can
    # interleave the MXU matmul, EUP sigmoid/tanh and the stores.
    h_f, c_f = jax.lax.fori_loop(0, t_chunk, step,
                                 (h_scr[...], c_scr[...]), unroll=True)
    h_scr[...] = h_f
    c_scr[...] = c_f


def _pick_time_chunk(T, max_chunk=64):
    """Largest divisor of T that is <= max_chunk (amortizes per-grid-step cost)."""
    for c in range(min(T, max_chunk), 0, -1):
        if T % c == 0:
            return c
    return 1


def subnet_forward(x, params):
    """x: (batch, seq_len, in_size) float32 -> (batch, seq_len, out_size) float32."""
    wih_t, whh_t, bias, w1_t, b1 = params
    B, T, D = x.shape
    H = whh_t.shape[0]
    O = w1_t.shape[1]
    Tc = _pick_time_chunk(T)
    num_chunks = T // Tc

    # Stage 1 (hoisted out of the recurrence): one (T*B, D) x (D, 4H) matmul.
    # The (B,T) -> (T,B) layout change is folded into the einsum output.
    # TODO(synk): on v6e/v7x cast x / wih_t (and whh_t / w1_t) to bfloat16 with f32
    #             accumulation; kept f32 here so the strict correctness check passes.
    gates_x = jnp.einsum('btd,dg->tbg', x, wih_t,
                         preferred_element_type=jnp.float32) + bias   # (T, B, 4H)

    kernel = functools.partial(_lstm_recurrence_kernel, hidden=H, t_chunk=Tc)

    gx_block = (Tc, B, 4 * H)
    gx_index = lambda c: (c, 0, 0)
    if num_chunks >= 3:
        # Deeper prefetch on the only time-varying input stream.
        gx_spec = pl.BlockSpec(gx_block, gx_index, pipeline_mode=pl.Buffered(3))
    else:
        gx_spec = pl.BlockSpec(gx_block, gx_index)

    # Stage 2: serial Pallas recurrence over time chunks -> h in (T, B, H).
    h_tbh = pl.pallas_call(
        kernel,
        out_shape=jax.ShapeDtypeStruct((T, B, H), jnp.float32),
        grid_spec=pltpu.PrefetchScalarGridSpec(
            num_scalar_prefetch=0,
            grid=(num_chunks,),
            in_specs=[
                gx_spec,                                      # gates_x chunk
                pl.BlockSpec((H, 4 * H), lambda c: (0, 0)),   # W_hh^T (VMEM-resident)
            ],
            out_specs=pl.BlockSpec((Tc, B, H), lambda c: (c, 0, 0)),
            scratch_shapes=[
                pltpu.VMEM((B, H), jnp.float32),   # h state (persists across chunks)
                pltpu.VMEM((B, H), jnp.float32),   # c state
            ],
        ),
        compiler_params=pltpu.CompilerParams(
            # The recurrence is inherently sequential over time; must stay "arbitrary".
            dimension_semantics=("arbitrary",),
        ),
    )(gates_x, whh_t)

    # Stage 3 (hoisted out of the recurrence): one (T*B, H) x (H, O) matmul + ReLU.
    # The (T,B) -> (B,T) layout change is folded into the einsum output.
    y = jnp.einsum('tbh,ho->bto', h_tbh, w1_t,
                   preferred_element_type=jnp.float32) + b1            # (B, T, O)
    return jnp.maximum(y, 0.0)


def init_params(key, in_size, hidden, out_size):
    k = jax.random.split(key, 6)
    s = 1.0 / jnp.sqrt(hidden)
    w_ih = jax.random.uniform(k[0], (4 * hidden, in_size), jnp.float32, -s, s)
    w_hh = jax.random.uniform(k[1], (4 * hidden, hidden), jnp.float32, -s, s)
    b_ih = jax.random.uniform(k[2], (4 * hidden,), jnp.float32, -s, s)
    b_hh = jax.random.uniform(k[3], (4 * hidden,), jnp.float32, -s, s)
    w1 = jax.random.uniform(k[4], (out_size, hidden), jnp.float32, -s, s)
    b1 = jax.random.uniform(k[5], (out_size,), jnp.float32, -s, s)
    # Pre-transpose weights / fold LSTM biases for the kernel.
    return (w_ih.T, w_hh.T, (b_ih + b_hh)[None, :], w1.T, b1[None, :]), \
           (w_ih, w_hh, b_ih, b_hh, w1, b1)


def subnet_reference(x, raw_params):
    """Pure-JAX reference (lax.scan LSTM) for the correctness check."""
    w_ih, w_hh, b_ih, b_hh, w1, b1 = raw_params
    B, T, D = x.shape
    H = w_hh.shape[1]

    def step(carry, x_t):
        h, c = carry
        gates = x_t @ w_ih.T + h @ w_hh.T + b_ih + b_hh
        i = jax.nn.sigmoid(gates[:, 0 * H:1 * H])
        f = jax.nn.sigmoid(gates[:, 1 * H:2 * H])
        g = jnp.tanh(gates[:, 2 * H:3 * H])
        o = jax.nn.sigmoid(gates[:, 3 * H:4 * H])
        c = f * c + i * g
        h = o * jnp.tanh(c)
        return (h, c), h

    h0 = jnp.zeros((B, H), jnp.float32)
    c0 = jnp.zeros((B, H), jnp.float32)
    _, hs = jax.lax.scan(step, (h0, c0), jnp.transpose(x, (1, 0, 2)))
    y = jnp.transpose(hs, (1, 0, 2))            # (B, T, H)
    return jnp.maximum(y @ w1.T + b1, 0.0)      # (B, T, O)


if __name__ == "__main__":
    B, T, IN, HID, OUT = 2, 8, 16, 32, 8

    key = jax.random.PRNGKey(0)
    kx, kp = jax.random.split(key)
    x = jax.random.normal(kx, (B, T, IN), jnp.float32)
    params, raw_params = init_params(kp, IN, HID, OUT)

    fwd = jax.jit(subnet_forward)
    y = fwd(x, params)
    y = jax.block_until_ready(y)

    y_ref = subnet_reference(x, raw_params)
    assert y.shape == (B, T, OUT)
    assert jnp.allclose(y, y_ref, atol=1e-4, rtol=1e-4), "mismatch vs reference"

    print("KERNEL_OK")
</pallas_src>

<mosaic_0001>
module attributes {stable_mosaic.version = 11 : i64} {
  func.func @_lstm_recurrence_kernel(%arg0: i32, %arg1: memref<8x2x128xf32, #tpu.memory_space<vmem>>, %arg2: memref<32x128xf32, #tpu.memory_space<vmem>>, %arg3: memref<8x2x32xf32, #tpu.memory_space<vmem>>, %arg4: memref<2x32xf32, #tpu.memory_space<vmem>>, %arg5: memref<2x32xf32, #tpu.memory_space<vmem>>) attributes {dimension_semantics = [#tpu.dimension_semantics<arbitrary>], iteration_bounds = array<i64: 1>, scalar_prefetch = 0 : i64, scratch_operands = 2 : i64, tpu.core_type = #tpu.core_type<tc>, window_params = [{transform_indices = @transform_0, window_bounds = array<i64: 8, 2, 128>}, {pipeline_mode = #tpu.pipeline_mode<synchronous>, transform_indices = @transform_1, window_bounds = array<i64: 32, 128>}, {transform_indices = @transform_2, window_bounds = array<i64: 8, 2, 32>}]} {
    %c0_i32 = arith.constant 0 : i32
    %0 = arith.cmpi eq, %arg0, %c0_i32 : i32
    %1 = arith.extui %0 : i1 to i32
    %c0_i32_0 = arith.constant 0 : i32
    %2 = arith.cmpi ne, %1, %c0_i32_0 : i32
    scf.if %2 {
      %cst_74 = arith.constant 0.000000e+00 : f32
      %280 = vector.broadcast %cst_74 : f32 to vector<2x32xf32>
      %c0_75 = arith.constant 0 : index
      %c0_76 = arith.constant 0 : index
      %281 = vector.load %arg4[%c0_75, %c0_76] : memref<2x32xf32, #tpu.memory_space<vmem>>, vector<2x32xf32>
      tpu.vector_store %arg4[%c0_75, %c0_76], %280 {strides = array<i32>} : memref<2x32xf32, #tpu.memory_space<vmem>>, vector<2x32xf32>,
      %cst_77 = arith.constant 0.000000e+00 : f32
      %282 = vector.broadcast %cst_77 : f32 to vector<2x32xf32>
      %c0_78 = arith.constant 0 : index
      %c0_79 = arith.constant 0 : index
      %283 = vector.load %arg5[%c0_78, %c0_79] : memref<2x32xf32, #tpu.memory_space<vmem>>, vector<2x32xf32>
      tpu.vector_store %arg5[%c0_78, %c0_79], %282 {strides = array<i32>} : memref<2x32xf32, #tpu.memory_space<vmem>>, vector<2x32xf32>,
    } else {
    }
    %c0 = arith.constant 0 : index
    %c0_1 = arith.constant 0 : index
    %3 = vector.load %arg2[%c0, %c0_1] : memref<32x128xf32, #tpu.memory_space<vmem>>, vector<32x128xf32>
    %c0_2 = arith.constant 0 : index
    %c0_3 = arith.constant 0 : index
    %4 = vector.load %arg4[%c0_2, %c0_3] : memref<2x32xf32, #tpu.memory_space<vmem>>, vector<2x32xf32>
    %c0_4 = arith.constant 0 : index
    %c0_5 = arith.constant 0 : index
    %5 = vector.load %arg5[%c0_4, %c0_5] : memref<2x32xf32, #tpu.memory_space<vmem>>, vector<2x32xf32>
    %c0_i32_6 = arith.constant 0 : i32
    %6 = arith.index_cast %c0_i32_6 : i32 to index
    %c0_7 = arith.constant 0 : index
    %c0_8 = arith.constant 0 : index
    %7 = vector.load %arg1[%6, %c0_7, %c0_8] : memref<8x2x128xf32, #tpu.memory_space<vmem>>, vector<1x2x128xf32>
    %8 = vector.shape_cast %7 : vector<1x2x128xf32> to vector<2x128xf32>
    %cst = arith.constant dense<0.000000e+00> : vector<2x128xf32>
    %9 = tpu.matmul %4, %3, %cst {dimension_numbers = #tpu.dot_dimension_numbers<[1], [0], [0], [1], [0, 0, 1, 1], [], []>} : vector<2x32xf32>, vector<32x128xf32>, vector<2x128xf32> -> vector<2x128xf32>
    %10 = arith.addf %8, %9 : vector<2x128xf32>
    %11 = vector.extract_strided_slice %10 {offsets = [0, 0], sizes = [2, 32], strides = [1, 1]} : vector<2x128xf32> to vector<2x32xf32>
    %12 = arith.negf %11 : vector<2x32xf32>
    %13 = math.exp %12 : vector<2x32xf32>
    %cst_9 = arith.constant 1.000000e+00 : f32
    %14 = vector.broadcast %cst_9 : f32 to vector<2x32xf32>
    %15 = arith.addf %14, %13 : vector<2x32xf32>
    %16 = arith.divf %14, %15 : vector<2x32xf32>
    %17 = vector.extract_strided_slice %10 {offsets = [0, 32], sizes = [2, 32], strides = [1, 1]} : vector<2x128xf32> to vector<2x32xf32>
    %18 = arith.negf %17 : vector<2x32xf32>
    %19 = math.exp %18 : vector<2x32xf32>
    %cst_10 = arith.constant 1.000000e+00 : f32
    %20 = vector.broadcast %cst_10 : f32 to vector<2x32xf32>
    %21 = arith.addf %20, %19 : vector<2x32xf32>
    %22 = arith.divf %20, %21 : vector<2x32xf32>
    %23 = vector.extract_strided_slice %10 {offsets = [0, 64], sizes = [2, 32], strides = [1, 1]} : vector<2x128xf32> to vector<2x32xf32>
    %24 = math.tanh %23 : vector<2x32xf32>
    %25 = vector.extract_strided_slice %10 {offsets = [0, 96], sizes = [2, 32], strides = [1, 1]} : vector<2x128xf32> to vector<2x32xf32>
    %26 = arith.negf %25 : vector<2x32xf32>
    %27 = math.exp %26 : vector<2x32xf32>
    %cst_11 = arith.constant 1.000000e+00 : f32
    %28 = vector.broadcast %cst_11 : f32 to vector<2x32xf32>
    %29 = arith.addf %28, %27 : vector<2x32xf32>
    %30 = arith.divf %28, %29 : vector<2x32xf32>
    %31 = arith.mulf %22, %5 : vector<2x32xf32>
    %32 = arith.mulf %16, %24 : vector<2x32xf32>
    %33 = arith.addf %31, %32 : vector<2x32xf32>
    %34 = math.tanh %33 : vector<2x32xf32>
    %35 = arith.mulf %30, %34 : vector<2x32xf32>
    %36 = arith.index_cast %c0_i32_6 : i32 to index
    %c0_12 = arith.constant 0 : index
    %c0_13 = arith.constant 0 : index
    %37 = vector.load %arg3[%36, %c0_12, %c0_13] : memref<8x2x32xf32, #tpu.memory_space<vmem>>, vector<1x2x32xf32>
    %38 = vector.shape_cast %37 : vector<1x2x32xf32> to vector<2x32xf32>
    %39 = vector.shape_cast %35 : vector<2x32xf32> to vector<1x2x32xf32>
    tpu.vector_store %arg3[%36, %c0_12, %c0_13], %39 {strides = array<i32>} : memref<8x2x32xf32, #tpu.memory_space<vmem>>, vector<1x2x32xf32>,
    %c1_i32 = arith.constant 1 : i32
    %40 = arith.index_cast %c1_i32 : i32 to index
    %c0_14 = arith.constant 0 : index
    %c0_15 = arith.constant 0 : index
    %41 = vector.load %arg1[%40, %c0_14, %c0_15] : memref<8x2x128xf32, #tpu.memory_space<vmem>>, vector<1x2x128xf32>
    %42 = vector.shape_cast %41 : vector<1x2x128xf32> to vector<2x128xf32>
    %cst_16 = arith.constant dense<0.000000e+00> : vector<2x128xf32>
    %43 = tpu.matmul %35, %3, %cst_16 {dimension_numbers = #tpu.dot_dimension_numbers<[1], [0], [0], [1], [0, 0, 1, 1], [], []>} : vector<2x32xf32>, vector<32x128xf32>, vector<2x128xf32> -> vector<2x128xf32>
    %44 = arith.addf %42, %43 : vector<2x128xf32>
    %45 = vector.extract_strided_slice %44 {offsets = [0, 0], sizes = [2, 32], strides = [1, 1]} : vector<2x128xf32> to vector<2x32xf32>
    %46 = arith.negf %45 : vector<2x32xf32>
    %47 = math.exp %46 : vector<2x32xf32>
    %cst_17 = arith.constant 1.000000e+00 : f32
    %48 = vector.broadcast %cst_17 : f32 to vector<2x32xf32>
    %49 = arith.addf %48, %47 : vector<2x32xf32>
    %50 = arith.divf %48, %49 : vector<2x32xf32>
    %51 = vector.extract_strided_slice %44 {offsets = [0, 32], sizes = [2, 32], strides = [1, 1]} : vector<2x128xf32> to vector<2x32xf32>
    %52 = arith.negf %51 : vector<2x32xf32>
    %53 = math.exp %52 : vector<2x32xf32>
    %cst_18 = arith.constant 1.000000e+00 : f32
    %54 = vector.broadcast %cst_18 : f32 to vector<2x32xf32>
    %55 = arith.addf %54, %53 : vector<2x32xf32>
    %56 = arith.divf %54, %55 : vector<2x32xf32>
    %57 = vector.extract_strided_slice %44 {offsets = [0, 64], sizes = [2, 32], strides = [1, 1]} : vector<2x128xf32> to vector<2x32xf32>
    %58 = math.tanh %57 : vector<2x32xf32>
    %59 = vector.extract_strided_slice %44 {offsets = [0, 96], sizes = [2, 32], strides = [1, 1]} : vector<2x128xf32> to vector<2x32xf32>
    %60 = arith.negf %59 : vector<2x32xf32>
    %61 = math.exp %60 : vector<2x32xf32>
    %cst_19 = arith.constant 1.000000e+00 : f32
    %62 = vector.broadcast %cst_19 : f32 to vector<2x32xf32>
    %63 = arith.addf %62, %61 : vector<2x32xf32>
    %64 = arith.divf %62, %63 : vector<2x32xf32>
    %65 = arith.mulf %56, %33 : vector<2x32xf32>
    %66 = arith.mulf %50, %58 : vector<2x32xf32>
    %67 = arith.addf %65, %66 : vector<2x32xf32>
    %68 = math.tanh %67 : vector<2x32xf32>
    %69 = arith.mulf %64, %68 : vector<2x32xf32>
    %70 = arith.index_cast %c1_i32 : i32 to index
    %c0_20 = arith.constant 0 : index
    %c0_21 = arith.constant 0 : index
    %71 = vector.load %arg3[%70, %c0_20, %c0_21] : memref<8x2x32xf32, #tpu.memory_space<vmem>>, vector<1x2x32xf32>
    %72 = vector.shape_cast %71 : vector<1x2x32xf32> to vector<2x32xf32>
    %73 = vector.shape_cast %69 : vector<2x32xf32> to vector<1x2x32xf32>
    tpu.vector_store %arg3[%70, %c0_20, %c0_21], %73 {strides = array<i32>} : memref<8x2x32xf32, #tpu.memory_space<vmem>>, vector<1x2x32xf32>,
    %c2_i32 = arith.constant 2 : i32
    %74 = arith.index_cast %c2_i32 : i32 to index
    %c0_22 = arith.constant 0 : index
    %c0_23 = arith.constant 0 : index
    %75 = vector.load %arg1[%74, %c0_22, %c0_23] : memref<8x2x128xf32, #tpu.memory_space<vmem>>, vector<1x2x128xf32>
    %76 = vector.shape_cast %75 : vector<1x2x128xf32> to vector<2x128xf32>
    %cst_24 = arith.constant dense<0.000000e+00> : vector<2x128xf32>
    %77 = tpu.matmul %69, %3, %cst_24 {dimension_numbers = #tpu.dot_dimension_numbers<[1], [0], [0], [1], [0, 0, 1, 1], [], []>} : vector<2x32xf32>, vector<32x128xf32>, vector<2x128xf32> -> vector<2x128xf32>
    %78 = arith.addf %76, %77 : vector<2x128xf32>
    %79 = vector.extract_strided_slice %78 {offsets = [0, 0], sizes = [2, 32], strides = [1, 1]} : vector<2x128xf32> to vector<2x32xf32>
    %80 = arith.negf %79 : vector<2x32xf32>
    %81 = math.exp %80 : vector<2x32xf32>
    %cst_25 = arith.constant 1.000000e+00 : f32
    %82 = vector.broadcast %cst_25 : f32 to vector<2x32xf32>
    %83 = arith.addf %82, %81 : vector<2x32xf32>
    %84 = arith.divf %82, %83 : vector<2x32xf32>
    %85 = vector.extract_strided_slice %78 {offsets = [0, 32], sizes = [2, 32], strides = [1, 1]} : vector<2x128xf32> to vector<2x32xf32>
    %86 = arith.negf %85 : vector<2x32xf32>
    %87 = math.exp %86 : vector<2x32xf32>
    %cst_26 = arith.constant 1.000000e+00 : f32
    %88 = vector.broadcast %cst_26 : f32 to vector<2x32xf32>
    %89 = arith.addf %88, %87 : vector<2x32xf32>
    %90 = arith.divf %88, %89 : vector<2x32xf32>
    %91 = vector.extract_strided_slice %78 {offsets = [0, 64], sizes = [2, 32], strides = [1, 1]} : vector<2x128xf32> to vector<2x32xf32>
    %92 = math.tanh %91 : vector<2x32xf32>
    %93 = vector.extract_strided_slice %78 {offsets = [0, 96], sizes = [2, 32], strides = [1, 1]} : vector<2x128xf32> to vector<2x32xf32>
    %94 = arith.negf %93 : vector<2x32xf32>
    %95 = math.exp %94 : vector<2x32xf32>
    %cst_27 = arith.constant 1.000000e+00 : f32
    %96 = vector.broadcast %cst_27 : f32 to vector<2x32xf32>
    %97 = arith.addf %96, %95 : vector<2x32xf32>
    %98 = arith.divf %96, %97 : vector<2x32xf32>
    %99 = arith.mulf %90, %67 : vector<2x32xf32>
    %100 = arith.mulf %84, %92 : vector<2x32xf32>
    %101 = arith.addf %99, %100 : vector<2x32xf32>
    %102 = math.tanh %101 : vector<2x32xf32>
    %103 = arith.mulf %98, %102 : vector<2x32xf32>
    %104 = arith.index_cast %c2_i32 : i32 to index
    %c0_28 = arith.constant 0 : index
    %c0_29 = arith.constant 0 : index
    %105 = vector.load %arg3[%104, %c0_28, %c0_29] : memref<8x2x32xf32, #tpu.memory_space<vmem>>, vector<1x2x32xf32>
    %106 = vector.shape_cast %105 : vector<1x2x32xf32> to vector<2x32xf32>
    %107 = vector.shape_cast %103 : vector<2x32xf32> to vector<1x2x32xf32>
    tpu.vector_store %arg3[%104, %c0_28, %c0_29], %107 {strides = array<i32>} : memref<8x2x32xf32, #tpu.memory_space<vmem>>, vector<1x2x32xf32>,
    %c3_i32 = arith.constant 3 : i32
    %108 = arith.index_cast %c3_i32 : i32 to index
    %c0_30 = arith.constant 0 : index
    %c0_31 = arith.constant 0 : index
    %109 = vector.load %arg1[%108, %c0_30, %c0_31] : memref<8x2x128xf32, #tpu.memory_space<vmem>>, vector<1x2x128xf32>
    %110 = vector.shape_cast %109 : vector<1x2x128xf32> to vector<2x128xf32>
    %cst_32 = arith.constant dense<0.000000e+00> : vector<2x128xf32>
    %111 = tpu.matmul %103, %3, %cst_32 {dimension_numbers = #tpu.dot_dimension_numbers<[1], [0], [0], [1], [0, 0, 1, 1], [], []>} : vector<2x32xf32>, vector<32x128xf32>, vector<2x128xf32> -> vector<2x128xf32>
    %112 = arith.addf %110, %111 : vector<2x128xf32>
    %113 = vector.extract_strided_slice %112 {offsets = [0, 0], sizes = [2, 32], strides = [1, 1]} : vector<2x128xf32> to vector<2x32xf32>
    %114 = arith.negf %113 : vector<2x32xf32>
    %115 = math.exp %114 : vector<2x32xf32>
    %cst_33 = arith.constant 1.000000e+00 : f32
    %116 = vector.broadcast %cst_33 : f32 to vector<2x32xf32>
    %117 = arith.addf %116, %115 : vector<2x32xf32>
    %118 = arith.divf %116, %117 : vector<2x32xf32>
    %119 = vector.extract_strided_slice %112 {offsets = [0, 32], sizes = [2, 32], strides = [1, 1]} : vector<2x128xf32> to vector<2x32xf32>
    %120 = arith.negf %119 : vector<2x32xf32>
    %121 = math.exp %120 : vector<2x32xf32>
    %cst_34 = arith.constant 1.000000e+00 : f32
    %122 = vector.broadcast %cst_34 : f32 to vector<2x32xf32>
    %123 = arith.addf %122, %121 : vector<2x32xf32>
    %124 = arith.divf %122, %123 : vector<2x32xf32>
    %125 = vector.extract_strided_slice %112 {offsets = [0, 64], sizes = [2, 32], strides = [1, 1]} : vector<2x128xf32> to vector<2x32xf32>
    %126 = math.tanh %125 : vector<2x32xf32>
    %127 = vector.extract_strided_slice %112 {offsets = [0, 96], sizes = [2, 32], strides = [1, 1]} : vector<2x128xf32> to vector<2x32xf32>
    %128 = arith.negf %127 : vector<2x32xf32>
    %129 = math.exp %128 : vector<2x32xf32>
    %cst_35 = arith.constant 1.000000e+00 : f32
    %130 = vector.broadcast %cst_35 : f32 to vector<2x32xf32>
    %131 = arith.addf %130, %129 : vector<2x32xf32>
    %132 = arith.divf %130, %131 : vector<2x32xf32>
    %133 = arith.mulf %124, %101 : vector<2x32xf32>
    %134 = arith.mulf %118, %126 : vector<2x32xf32>
    %135 = arith.addf %133, %134 : vector<2x32xf32>
    %136 = math.tanh %135 : vector<2x32xf32>
    %137 = arith.mulf %132, %136 : vector<2x32xf32>
    %138 = arith.index_cast %c3_i32 : i32 to index
    %c0_36 = arith.constant 0 : index
    %c0_37 = arith.constant 0 : index
    %139 = vector.load %arg3[%138, %c0_36, %c0_37] : memref<8x2x32xf32, #tpu.memory_space<vmem>>, vector<1x2x32xf32>
    %140 = vector.shape_cast %139 : vector<1x2x32xf32> to vector<2x32xf32>
    %141 = vector.shape_cast %137 : vector<2x32xf32> to vector<1x2x32xf32>
    tpu.vector_store %arg3[%138, %c0_36, %c0_37], %141 {strides = array<i32>} : memref<8x2x32xf32, #tpu.memory_space<vmem>>, vector<1x2x32xf32>,
    %c4_i32 = arith.constant 4 : i32
    %142 = arith.index_cast %c4_i32 : i32 to index
    %c0_38 = arith.constant 0 : index
    %c0_39 = arith.constant 0 : index
    %143 = vector.load %arg1[%142, %c0_38, %c0_39] : memref<8x2x128xf32, #tpu.memory_space<vmem>>, vector<1x2x128xf32>
    %144 = vector.shape_cast %143 : vector<1x2x128xf32> to vector<2x128xf32>
    %cst_40 = arith.constant dense<0.000000e+00> : vector<2x128xf32>
    %145 = tpu.matmul %137, %3, %cst_40 {dimension_numbers = #tpu.dot_dimension_numbers<[1], [0], [0], [1], [0, 0, 1, 1], [], []>} : vector<2x32xf32>, vector<32x128xf32>, vector<2x128xf32> -> vector<2x128xf32>
    %146 = arith.addf %144, %145 : vector<2x128xf32>
    %147 = vector.extract_strided_slice %146 {offsets = [0, 0], sizes = [2, 32], strides = [1, 1]} : vector<2x128xf32> to vector<2x32xf32>
    %148 = arith.negf %147 : vector<2x32xf32>
    %149 = math.exp %148 : vector<2x32xf32>
    %cst_41 = arith.constant 1.000000e+00 : f32
    %150 = vector.broadcast %cst_41 : f32 to vector<2x32xf32>
    %151 = arith.addf %150, %149 : vector<2x32xf32>
    %152 = arith.divf %150, %151 : vector<2x32xf32>
    %153 = vector.extract_strided_slice %146 {offsets = [0, 32], sizes = [2, 32], strides = [1, 1]} : vector<2x128xf32> to vector<2x32xf32>
    %154 = arith.negf %153 : vector<2x32xf32>
    %155 = math.exp %154 : vector<2x32xf32>
    %cst_42 = arith.constant 1.000000e+00 : f32
    %156 = vector.broadcast %cst_42 : f32 to vector<2x32xf32>
    %157 = arith.addf %156, %155 : vector<2x32xf32>
    %158 = arith.divf %156, %157 : vector<2x32xf32>
    %159 = vector.extract_strided_slice %146 {offsets = [0, 64], sizes = [2, 32], strides = [1, 1]} : vector<2x128xf32> to vector<2x32xf32>
    %160 = math.tanh %159 : vector<2x32xf32>
    %161 = vector.extract_strided_slice %146 {offsets = [0, 96], sizes = [2, 32], strides = [1, 1]} : vector<2x128xf32> to vector<2x32xf32>
    %162 = arith.negf %161 : vector<2x32xf32>
    %163 = math.exp %162 : vector<2x32xf32>
    %cst_43 = arith.constant 1.000000e+00 : f32
    %164 = vector.broadcast %cst_43 : f32 to vector<2x32xf32>
    %165 = arith.addf %164, %163 : vector<2x32xf32>
    %166 = arith.divf %164, %165 : vector<2x32xf32>
    %167 = arith.mulf %158, %135 : vector<2x32xf32>
    %168 = arith.mulf %152, %160 : vector<2x32xf32>
    %169 = arith.addf %167, %168 : vector<2x32xf32>
    %170 = math.tanh %169 : vector<2x32xf32>
    %171 = arith.mulf %166, %170 : vector<2x32xf32>
    %172 = arith.index_cast %c4_i32 : i32 to index
    %c0_44 = arith.constant 0 : index
    %c0_45 = arith.constant 0 : index
    %173 = vector.load %arg3[%172, %c0_44, %c0_45] : memref<8x2x32xf32, #tpu.memory_space<vmem>>, vector<1x2x32xf32>
    %174 = vector.shape_cast %173 : vector<1x2x32xf32> to vector<2x32xf32>
    %175 = vector.shape_cast %171 : vector<2x32xf32> to vector<1x2x32xf32>
    tpu.vector_store %arg3[%172, %c0_44, %c0_45], %175 {strides = array<i32>} : memref<8x2x32xf32, #tpu.memory_space<vmem>>, vector<1x2x32xf32>,
    %c5_i32 = arith.constant 5 : i32
    %176 = arith.index_cast %c5_i32 : i32 to index
    %c0_46 = arith.constant 0 : index
    %c0_47 = arith.constant 0 : index
    %177 = vector.load %arg1[%176, %c0_46, %c0_47] : memref<8x2x128xf32, #tpu.memory_space<vmem>>, vector<1x2x128xf32>
    %178 = vector.shape_cast %177 : vector<1x2x128xf32> to vector<2x128xf32>
    %cst_48 = arith.constant dense<0.000000e+00> : vector<2x128xf32>
    %179 = tpu.matmul %171, %3, %cst_48 {dimension_numbers = #tpu.dot_dimension_numbers<[1], [0], [0], [1], [0, 0, 1, 1], [], []>} : vector<2x32xf32>, vector<32x128xf32>, vector<2x128xf32> -> vector<2x128xf32>
    %180 = arith.addf %178, %179 : vector<2x128xf32>
    %181 = vector.extract_strided_slice %180 {offsets = [0, 0], sizes = [2, 32], strides = [1, 1]} : vector<2x128xf32> to vector<2x32xf32>
    %182 = arith.negf %181 : vector<2x32xf32>
    %183 = math.exp %182 : vector<2x32xf32>
    %cst_49 = arith.constant 1.000000e+00 : f32
    %184 = vector.broadcast %cst_49 : f32 to vector<2x32xf32>
    %185 = arith.addf %184, %183 : vector<2x32xf32>
    %186 = arith.divf %184, %185 : vector<2x32xf32>
    %187 = vector.extract_strided_slice %180 {offsets = [0, 32], sizes = [2, 32], strides = [1, 1]} : vector<2x128xf32> to vector<2x32xf32>
    %188 = arith.negf %187 : vector<2x32xf32>
    %189 = math.exp %188 : vector<2x32xf32>
    %cst_50 = arith.constant 1.000000e+00 : f32
    %190 = vector.broadcast %cst_50 : f32 to vector<2x32xf32>
    %191 = arith.addf %190, %189 : vector<2x32xf32>
    %192 = arith.divf %190, %191 : vector<2x32xf32>
    %193 = vector.extract_strided_slice %180 {offsets = [0, 64], sizes = [2, 32], strides = [1, 1]} : vector<2x128xf32> to vector<2x32xf32>
    %194 = math.tanh %193 : vector<2x32xf32>
    %195 = vector.extract_strided_slice %180 {offsets = [0, 96], sizes = [2, 32], strides = [1, 1]} : vector<2x128xf32> to vector<2x32xf32>
    %196 = arith.negf %195 : vector<2x32xf32>
    %197 = math.exp %196 : vector<2x32xf32>
    %cst_51 = arith.constant 1.000000e+00 : f32
    %198 = vector.broadcast %cst_51 : f32 to vector<2x32xf32>
    %199 = arith.addf %198, %197 : vector<2x32xf32>
    %200 = arith.divf %198, %199 : vector<2x32xf32>
    %201 = arith.mulf %192, %169 : vector<2x32xf32>
    %202 = arith.mulf %186, %194 : vector<2x32xf32>
    %203 = arith.addf %201, %202 : vector<2x32xf32>
    %204 = math.tanh %203 : vector<2x32xf32>
    %205 = arith.mulf %200, %204 : vector<2x32xf32>
    %206 = arith.index_cast %c5_i32 : i32 to index
    %c0_52 = arith.constant 0 : index
    %c0_53 = arith.constant 0 : index
    %207 = vector.load %arg3[%206, %c0_52, %c0_53] : memref<8x2x32xf32, #tpu.memory_space<vmem>>, vector<1x2x32xf32>
    %208 = vector.shape_cast %207 : vector<1x2x32xf32> to vector<2x32xf32>
    %209 = vector.shape_cast %205 : vector<2x32xf32> to vector<1x2x32xf32>
    tpu.vector_store %arg3[%206, %c0_52, %c0_53], %209 {strides = array<i32>} : memref<8x2x32xf32, #tpu.memory_space<vmem>>, vector<1x2x32xf32>,
    %c6_i32 = arith.constant 6 : i32
    %210 = arith.index_cast %c6_i32 : i32 to index
    %c0_54 = arith.constant 0 : index
    %c0_55 = arith.constant 0 : index
    %211 = vector.load %arg1[%210, %c0_54, %c0_55] : memref<8x2x128xf32, #tpu.memory_space<vmem>>, vector<1x2x128xf32>
    %212 = vector.shape_cast %211 : vector<1x2x128xf32> to vector<2x128xf32>
    %cst_56 = arith.constant dense<0.000000e+00> : vector<2x128xf32>
    %213 = tpu.matmul %205, %3, %cst_56 {dimension_numbers = #tpu.dot_dimension_numbers<[1], [0], [0], [1], [0, 0, 1, 1], [], []>} : vector<2x32xf32>, vector<32x128xf32>, vector<2x128xf32> -> vector<2x128xf32>
    %214 = arith.addf %212, %213 : vector<2x128xf32>
    %215 = vector.extract_strided_slice %214 {offsets = [0, 0], sizes = [2, 32], strides = [1, 1]} : vector<2x128xf32> to vector<2x32xf32>
    %216 = arith.negf %215 : vector<2x32xf32>
    %217 = math.exp %216 : vector<2x32xf32>
    %cst_57 = arith.constant 1.000000e+00 : f32
    %218 = vector.broadcast %cst_57 : f32 to vector<2x32xf32>
    %219 = arith.addf %218, %217 : vector<2x32xf32>
    %220 = arith.divf %218, %219 : vector<2x32xf32>
    %221 = vector.extract_strided_slice %214 {offsets = [0, 32], sizes = [2, 32], strides = [1, 1]} : vector<2x128xf32> to vector<2x32xf32>
    %222 = arith.negf %221 : vector<2x32xf32>
    %223 = math.exp %222 : vector<2x32xf32>
    %cst_58 = arith.constant 1.000000e+00 : f32
    %224 = vector.broadcast %cst_58 : f32 to vector<2x32xf32>
    %225 = arith.addf %224, %223 : vector<2x32xf32>
    %226 = arith.divf %224, %225 : vector<2x32xf32>
    %227 = vector.extract_strided_slice %214 {offsets = [0, 64], sizes = [2, 32], strides = [1, 1]} : vector<2x128xf32> to vector<2x32xf32>
    %228 = math.tanh %227 : vector<2x32xf32>
    %229 = vector.extract_strided_slice %214 {offsets = [0, 96], sizes = [2, 32], strides = [1, 1]} : vector<2x128xf32> to vector<2x32xf32>
    %230 = arith.negf %229 : vector<2x32xf32>
    %231 = math.exp %230 : vector<2x32xf32>
    %cst_59 = arith.constant 1.000000e+00 : f32
    %232 = vector.broadcast %cst_59 : f32 to vector<2x32xf32>
    %233 = arith.addf %232, %231 : vector<2x32xf32>
    %234 = arith.divf %232, %233 : vector<2x32xf32>
    %235 = arith.mulf %226, %203 : vector<2x32xf32>
    %236 = arith.mulf %220, %228 : vector<2x32xf32>
    %237 = arith.addf %235, %236 : vector<2x32xf32>
    %238 = math.tanh %237 : vector<2x32xf32>
    %239 = arith.mulf %234, %238 : vector<2x32xf32>
    %240 = arith.index_cast %c6_i32 : i32 to index
    %c0_60 = arith.constant 0 : index
    %c0_61 = arith.constant 0 : index
    %241 = vector.load %arg3[%240, %c0_60, %c0_61] : memref<8x2x32xf32, #tpu.memory_space<vmem>>, vector<1x2x32xf32>
    %242 = vector.shape_cast %241 : vector<1x2x32xf32> to vector<2x32xf32>
    %243 = vector.shape_cast %239 : vector<2x32xf32> to vector<1x2x32xf32>
    tpu.vector_store %arg3[%240, %c0_60, %c0_61], %243 {strides = array<i32>} : memref<8x2x32xf32, #tpu.memory_space<vmem>>, vector<1x2x32xf32>,
    %c7_i32 = arith.constant 7 : i32
    %244 = arith.index_cast %c7_i32 : i32 to index
    %c0_62 = arith.constant 0 : index
    %c0_63 = arith.constant 0 : index
    %245 = vector.load %arg1[%244, %c0_62, %c0_63] : memref<8x2x128xf32, #tpu.memory_space<vmem>>, vector<1x2x128xf32>
    %246 = vector.shape_cast %245 : vector<1x2x128xf32> to vector<2x128xf32>
    %cst_64 = arith.constant dense<0.000000e+00> : vector<2x128xf32>
    %247 = tpu.matmul %239, %3, %cst_64 {dimension_numbers = #tpu.dot_dimension_numbers<[1], [0], [0], [1], [0, 0, 1, 1], [], []>} : vector<2x32xf32>, vector<32x128xf32>, vector<2x128xf32> -> vector<2x128xf32>
    %248 = arith.addf %246, %247 : vector<2x128xf32>
    %249 = vector.extract_strided_slice %248 {offsets = [0, 0], sizes = [2, 32], strides = [1, 1]} : vector<2x128xf32> to vector<2x32xf32>
    %250 = arith.negf %249 : vector<2x32xf32>
    %251 = math.exp %250 : vector<2x32xf32>
    %cst_65 = arith.constant 1.000000e+00 : f32
    %252 = vector.broadcast %cst_65 : f32 to vector<2x32xf32>
    %253 = arith.addf %252, %251 : vector<2x32xf32>
    %254 = arith.divf %252, %253 : vector<2x32xf32>
    %255 = vector.extract_strided_slice %248 {offsets = [0, 32], sizes = [2, 32], strides = [1, 1]} : vector<2x128xf32> to vector<2x32xf32>
    %256 = arith.negf %255 : vector<2x32xf32>
    %257 = math.exp %256 : vector<2x32xf32>
    %cst_66 = arith.constant 1.000000e+00 : f32
    %258 = vector.broadcast %cst_66 : f32 to vector<2x32xf32>
    %259 = arith.addf %258, %257 : vector<2x32xf32>
    %260 = arith.divf %258, %259 : vector<2x32xf32>
    %261 = vector.extract_strided_slice %248 {offsets = [0, 64], sizes = [2, 32], strides = [1, 1]} : vector<2x128xf32> to vector<2x32xf32>
    %262 = math.tanh %261 : vector<2x32xf32>
    %263 = vector.extract_strided_slice %248 {offsets = [0, 96], sizes = [2, 32], strides = [1, 1]} : vector<2x128xf32> to vector<2x32xf32>
    %264 = arith.negf %263 : vector<2x32xf32>
    %265 = math.exp %264 : vector<2x32xf32>
    %cst_67 = arith.constant 1.000000e+00 : f32
    %266 = vector.broadcast %cst_67 : f32 to vector<2x32xf32>
    %267 = arith.addf %266, %265 : vector<2x32xf32>
    %268 = arith.divf %266, %267 : vector<2x32xf32>
    %269 = arith.mulf %260, %237 : vector<2x32xf32>
    %270 = arith.mulf %254, %262 : vector<2x32xf32>
    %271 = arith.addf %269, %270 : vector<2x32xf32>
    %272 = math.tanh %271 : vector<2x32xf32>
    %273 = arith.mulf %268, %272 : vector<2x32xf32>
    %274 = arith.index_cast %c7_i32 : i32 to index
    %c0_68 = arith.constant 0 : index
    %c0_69 = arith.constant 0 : index
    %275 = vector.load %arg3[%274, %c0_68, %c0_69] : memref<8x2x32xf32, #tpu.memory_space<vmem>>, vector<1x2x32xf32>
    %276 = vector.shape_cast %275 : vector<1x2x32xf32> to vector<2x32xf32>
    %277 = vector.shape_cast %273 : vector<2x32xf32> to vector<1x2x32xf32>
    tpu.vector_store %arg3[%274, %c0_68, %c0_69], %277 {strides = array<i32>} : memref<8x2x32xf32, #tpu.memory_space<vmem>>, vector<1x2x32xf32>,
    %c8_i32 = arith.constant 8 : i32
    %c0_70 = arith.constant 0 : index
    %c0_71 = arith.constant 0 : index
    %278 = vector.load %arg4[%c0_70, %c0_71] : memref<2x32xf32, #tpu.memory_space<vmem>>, vector<2x32xf32>
    tpu.vector_store %arg4[%c0_70, %c0_71], %273 {strides = array<i32>} : memref<2x32xf32, #tpu.memory_space<vmem>>, vector<2x32xf32>,
    %c0_72 = arith.constant 0 : index
    %c0_73 = arith.constant 0 : index
    %279 = vector.load %arg5[%c0_72, %c0_73] : memref<2x32xf32, #tpu.memory_space<vmem>>, vector<2x32xf32>
    tpu.vector_store %arg5[%c0_72, %c0_73], %271 {strides = array<i32>} : memref<2x32xf32, #tpu.memory_space<vmem>>, vector<2x32xf32>,
    return
  }
  func.func @transform_0(%arg0: i32) -> (i32, i32, i32) {
    %c0_i32 = arith.constant 0 : i32
    %c0_i32_0 = arith.constant 0 : i32
    %c0_i32_1 = arith.constant 0 : i32
    return %arg0, %c0_i32, %c0_i32_0 : i32, i32, i32
  }
  func.func @transform_1(%arg0: i32) -> (i32, i32) {
    %c0_i32 = arith.constant 0 : i32
    %c0_i32_0 = arith.constant 0 : i32
    %c0_i32_1 = arith.constant 0 : i32
    return %c0_i32, %c0_i32_0 : i32, i32
  }
  func.func @transform_2(%arg0: i32) -> (i32, i32, i32) {
    %c0_i32 = arith.constant 0 : i32
    %c0_i32_0 = arith.constant 0 : i32
    %c0_i32_1 = arith.constant 0 : i32
    return %arg0, %c0_i32, %c0_i32_0 : i32, i32, i32
  }
}

</mosaic_0001>

<bundles_post_ra>
// kernel: subnet_forward.1
= control target key start
LH: loop header
LB: loop body
LE: loop exit
PB: predicated region body
PF: predicated region fallthrough
CT: control target
= control target key end

     0   :  { %vm15_vm0 = vcmask 254976   ;;  %v681_v2 = vmov 0.0   ;;  %vm25_vm1 = vcmask 261120   ;;  %s682_s18 = smov 64   ;;  %s683_s19 = smov 32   ;;  %s813_s1 = inlined_call_operand.vmem [shape: f32[32,128], index: 1, kind: input, shape index: {}]   ;;  %s814_s0 = inlined_call_operand.vmem [shape: f32[8,2,128], index: 0, kind: input, shape index: {}]   ;;  %s815_s2 = inlined_call_operand.vmem [shape: f32[8,2,32], index: 2, kind: output, shape index: {}]  }
   0x1   :  { %v21_v0 = vld [vmem:[%s813_s1 + $0x18] sm:$0xff]  ;;  %v20_v1 = vld [vmem:[%s813_s1 + $0x10] sm:$0xff]  ;;  %16 = vst.msk [vmem:[#allocation2] sm:$0x3] %vm15_vm0, %v681_v2  ;;  %v19_v3 = vld [vmem:[%s813_s1 + $0x8] sm:$0xff] }
   0x2   :  { %41 = vmatpush.msra.mxu0 %v21_v0  ;;  %17 = vst.msk [vmem:[#allocation3] sm:$0x3] %vm15_vm0, %v681_v2  ;;  %113 = vmatpush.msra.mxu1 %v21_v0  ;;  %v18_v4 = vld [vmem:[%s813_s1] sm:$0xff] }
   0x3   :  { %181 = vmatpush.msra.mxu2 %v21_v0  ;;  %249 = vmatpush.msra.mxu3 %v21_v0  ;;  %v24_v6 = vld [vmem:[%s814_s0] sm:$0x3]  ;;  %v585_v34 = vld [vmem:[%s814_s0 + $0x2] sm:$0x3]  ;;  %v589_v60 = vld [vmem:[%s814_s0 + $0x4] sm:$0x3] }
   0x4   :  { %42 = vmatpush.msra.mxu0 %v20_v1  ;;  %114 = vmatpush.msra.mxu1 %v20_v1 }
   0x5   :  { %182 = vmatpush.msra.mxu2 %v20_v1  ;;  %250 = vmatpush.msra.mxu3 %v20_v1 }
   0x6   :  { %43 = vmatpush.msra.mxu0 %v19_v3  ;;  %115 = vmatpush.msra.mxu1 %v19_v3 }
   0x7   :  { %183 = vmatpush.msra.mxu2 %v19_v3  ;;  %251 = vmatpush.msra.mxu3 %v19_v3 }
   0x8   :  { %44 = vmatpush.msra.mxu0 %v18_v4  ;;  %v22_v5 = vld [vmem:[#allocation2] sm:$0x3]  ;;  %116 = vmatpush.msra.mxu1 %v18_v4 }
   0x9   :  { %583 = vmatmul.msk.f32.vlgmr.msra.gmra.mxu0 %vm25_vm1, %v22_v5  ;;  %184 = vmatpush.msra.mxu2 %v18_v4  ;;  %v23_v10 = vld [vmem:[#allocation3] sm:$0x3] }
   0xa   :  { %252 = vmatpush.msra.mxu3 %v18_v4  ;;  %317 = vmatpush.msrb.mxu0 %v21_v0 }
   0xb   :  { %385 = vmatpush.msrb.mxu1 %v21_v0  ;;  %453 = vmatpush.msrb.mxu2 %v21_v0 }
   0xc   :  { %318 = vmatpush.msrb.mxu0 %v20_v1  ;;  %521 = vmatpush.msrb.mxu3 %v21_v0 }
   0xd   :  { %386 = vmatpush.msrb.mxu1 %v20_v1  ;;  %454 = vmatpush.msrb.mxu2 %v20_v1 }
   0xe   :  { %319 = vmatpush.msrb.mxu0 %v19_v3  ;;  %522 = vmatpush.msrb.mxu3 %v20_v1 }
   0xf   :  { %387 = vmatpush.msrb.mxu1 %v19_v3  ;;  %455 = vmatpush.msrb.mxu2 %v19_v3 }
  0x10   :  { %320 = vmatpush.msrb.mxu0 %v18_v4  ;;  %523 = vmatpush.msrb.mxu3 %v19_v3 }
  0x11   :  { %388 = vmatpush.msrb.mxu1 %v18_v4  ;;  %456 = vmatpush.msrb.mxu2 %v18_v4 }
  0x12   :  { %524 = vmatpush.msrb.mxu3 %v18_v4 }
  0x86   :  { %v46_v7 = vpop.f32.mrf.mxu0 }
  0x87   :  { %v49_v8 = vadd.f32 %v46_v7, %v24_v6 }
  0x89   :  { %617 = vtanh.f32 %v49_v8  ;;  %v584_v11 = vmul.f32 -1.442695, %v49_v8 }
  0x8b   :  { %619 = vpow2.f32 %v584_v11 }
  0x8f   :  { %v618_v9 = vpop.eup %617 }
  0x90   :  { %76 = vrot.lane.b32.xlu0 %v618_v9, %s682_s18 }
  0x91   :  { %v620_v12 = vpop.eup %619 }
  0x92   :  { %v53_v13 = vadd.f32 1.0, %v620_v12 }
  0x94   :  { %621 = vrcp.f32 %v53_v13  ;;  %v65_v19 = vand.u32 2147483648, %v53_v13  ;;  %vm59_vm3 = vweird.f32 %v53_v13  ;;  %v63_v20 = vand.u32 2147483647, %v53_v13 }
  0x96   :  { %v66_v22 = vor.u32 1.1754944e-38, %v65_v19  ;;  %vm64_vm5 = vcmp.eq.f32.partialorder %v63_v20, 8.507059e+37 }
  0x98   :  { %71 = vrot.lane.b32.xlu0 %v23_v10, %s683_s19 }
  0x9a   :  { %v622_v14 = vpop.eup %621 }
  0x9b   :  { %v55_v15 = vmul.f32 %v622_v14, %v53_v13  ;;  %vm60_vm2 = vweird.f32 %v622_v14 }
  0x9c   :  { %vm61_vm4 = vmor %vm59_vm3, %vm60_vm2 }
  0x9d   :  { %v56_v16 = vsub.f32 1.0, %v55_v15 }
  0x9f   :  { %v57_v17 = vmul.f32 %v622_v14, %v56_v16 }
  0xa1   :  { %v58_v18 = vadd.f32 %v622_v14, %v57_v17 }
  0xa3   :  { %v62_v21 = vsel %vm61_vm4, %v622_v14, %v58_v18 }
  0xa4   :  { %v67_v24 = vsel %vm64_vm5, %v66_v22, %v62_v21  ;;  %v593_v22 = vld [vmem:[%s814_s0 + $0x6] sm:$0x3] }
 0x102   :  { %v77_v23 = vpop.permute.xlu0 %76 }
 0x103   :  { %v79_v25 = vmul.f32 %v77_v23, %v67_v24 }
 0x105   :  { %81 = vrot.lane.b32.xlu1 %v79_v25, %s683_s19 }
 0x10a   :  { %v72_v26 = vpop.permute.xlu0 %71 }
 0x10b   :  { %v74_v27 = vmul.f32 %v72_v26, %v67_v24 }
 0x177   :  { %v82_v28 = vpop.permute.xlu1 %81 }
 0x178   :  { %v84_v29 = vadd.f32 %v82_v28, %v74_v27 }
 0x17a   :  { %623 = vtanh.f32 %v84_v29 }
 0x180   :  { %v624_v30 = vpop.eup %623 }
 0x181   :  { %87 = vrot.lane.b32.xlu1 %v624_v30, %s682_s18 }
 0x1f3   :  { %v88_v31 = vpop.permute.xlu1 %87 }
 0x1f4   :  { %v90_v32 = vmul.f32 %v88_v31, %v67_v24 }
 0x1f6   :  { %92 = vrot.lane.b32.xlu2 %v90_v32, %s683_s19 }
 0x250   :  { %v93_v33 = vpop.permute.xlu2 %92 }
 0x251   :  { %96 = vst.msk [vmem:[%s815_s2] sm:$0x3] %vm15_vm0, %v93_v33  ;;  %586 = vmatmul.msk.f32.vlgmr.msra.gmra.mxu1 %vm25_vm1, %v93_v33 }
 0x2ce   :  { %v118_v35 = vpop.f32.mrf.mxu1 }
 0x2cf   :  { %v121_v36 = vadd.f32 %v585_v34, %v118_v35 }
 0x2d1   :  { %625 = vtanh.f32 %v121_v36  ;;  %v587_v38 = vmul.f32 -1.442695, %v121_v36 }
 0x2d3   :  { %627 = vpow2.f32 %v587_v38 }
 0x2d7   :  { %v626_v37 = vpop.eup %625 }
 0x2d8   :  { %144 = vrot.lane.b32.xlu2 %v626_v37, %s682_s18 }
 0x2d9   :  { %v628_v39 = vpop.eup %627 }
 0x2da   :  { %v125_v40 = vadd.f32 1.0, %v628_v39 }
 0x2dc   :  { %629 = vrcp.f32 %v125_v40  ;;  %v137_v46 = vand.u32 2147483648, %v125_v40  ;;  %vm131_vm7 = vweird.f32 %v125_v40  ;;  %v135_v47 = vand.u32 2147483647, %v125_v40 }
 0x2de   :  { %v138_v49 = vor.u32 1.1754944e-38, %v137_v46  ;;  %vm136_vm9 = vcmp.eq.f32.partialorder %v135_v47, 8.507059e+37 }
 0x2e2   :  { %v630_v41 = vpop.eup %629 }
 0x2e3   :  { %v127_v42 = vmul.f32 %v630_v41, %v125_v40  ;;  %vm132_vm6 = vweird.f32 %v630_v41 }
 0x2e4   :  { %vm133_vm8 = vmor %vm131_vm7, %vm132_vm6 }
 0x2e5   :  { %v128_v43 = vsub.f32 1.0, %v127_v42 }
 0x2e7   :  { %v129_v44 = vmul.f32 %v630_v41, %v128_v43 }
 0x2e9   :  { %v130_v45 = vadd.f32 %v630_v41, %v129_v44 }
 0x2eb   :  { %v134_v48 = vsel %vm133_vm8, %v630_v41, %v130_v45 }
 0x2ec   :  { %v139_v51 = vsel %vm136_vm9, %v138_v49, %v134_v48  ;;  %v597_v48 = vld [vmem:[%s814_s0 + $0x8] sm:$0x3] }
 0x2ed   :  { %v142_v53 = vmul.f32 %v139_v51, %v84_v29 }
 0x332   :  { %v145_v50 = vpop.permute.xlu2 %144 }
 0x333   :  { %v147_v52 = vmul.f32 %v145_v50, %v139_v51 }
 0x335   :  { %149 = vrot.lane.b32.xlu0 %v147_v52, %s683_s19 }
 0x3a7   :  { %v150_v54 = vpop.permute.xlu0 %149 }
 0x3a8   :  { %v152_v55 = vadd.f32 %v150_v54, %v142_v53 }
 0x3aa   :  { %631 = vtanh.f32 %v152_v55 }
 0x3b0   :  { %v632_v56 = vpop.eup %631 }
 0x3b1   :  { %155 = vrot.lane.b32.xlu1 %v632_v56, %s682_s18 }
 0x423   :  { %v156_v57 = vpop.permute.xlu1 %155 }
 0x424   :  { %v158_v58 = vmul.f32 %v156_v57, %v139_v51 }
 0x426   :  { %160 = vrot.lane.b32.xlu2 %v158_v58, %s683_s19 }
 0x480   :  { %v161_v59 = vpop.permute.xlu2 %160 }
 0x481   :  { %588 = vst.msk [vmem:[%s815_s2 + $0x2] sm:$0x3] %vm15_vm0, %v161_v59  ;;  %590 = vmatmul.msk.f32.vlgmr.msra.gmra.mxu2 %vm25_vm1, %v161_v59 }
 0x504   :  { %v186_v61 = vpop.f32.mrf.mxu2 }
 0x505   :  { %v189_v62 = vadd.f32 %v589_v60, %v186_v61 }
 0x507   :  { %633 = vtanh.f32 %v189_v62  ;;  %v591_v0 = vmul.f32 -1.442695, %v189_v62 }
 0x509   :  { %635 = vpow2.f32 %v591_v0 }
 0x50d   :  { %v634_v63 = vpop.eup %633 }
 0x50e   :  { %212 = vrot.lane.b32.xlu0 %v634_v63, %s682_s18 }
 0x50f   :  { %v636_v1 = vpop.eup %635 }
 0x510   :  { %v193_v2 = vadd.f32 1.0, %v636_v1 }
 0x512   :  { %637 = vrcp.f32 %v193_v2  ;;  %v205_v8 = vand.u32 2147483648, %v193_v2  ;;  %vm199_vm11 = vweird.f32 %v193_v2  ;;  %v203_v9 = vand.u32 2147483647, %v193_v2 }
 0x514   :  { %v206_v11 = vor.u32 1.1754944e-38, %v205_v8  ;;  %vm204_vm13 = vcmp.eq.f32.partialorder %v203_v9, 8.507059e+37 }
 0x518   :  { %v638_v3 = vpop.eup %637 }
 0x519   :  { %v195_v4 = vmul.f32 %v638_v3, %v193_v2  ;;  %vm200_vm10 = vweird.f32 %v638_v3 }
 0x51a   :  { %vm201_vm12 = vmor %vm199_vm11, %vm200_vm10 }
 0x51b   :  { %v196_v5 = vsub.f32 1.0, %v195_v4 }
 0x51d   :  { %v197_v6 = vmul.f32 %v638_v3, %v196_v5 }
 0x51f   :  { %v198_v7 = vadd.f32 %v638_v3, %v197_v6 }
 0x521   :  { %v202_v10 = vsel %vm201_vm12, %v638_v3, %v198_v7 }
 0x522   :  { %v207_v13 = vsel %vm204_vm13, %v206_v11, %v202_v10  ;;  %v601_v10 = vld [vmem:[%s814_s0 + $0xa] sm:$0x3] }
 0x523   :  { %v210_v15 = vmul.f32 %v207_v13, %v152_v55 }
 0x580   :  { %v213_v12 = vpop.permute.xlu0 %212 }
 0x581   :  { %v215_v14 = vmul.f32 %v213_v12, %v207_v13 }
 0x583   :  { %217 = vrot.lane.b32.xlu1 %v215_v14, %s683_s19 }
 0x5f5   :  { %v218_v16 = vpop.permute.xlu1 %217 }
 0x5f6   :  { %v220_v17 = vadd.f32 %v218_v16, %v210_v15 }
 0x5f8   :  { %639 = vtanh.f32 %v220_v17 }
 0x5fe   :  { %v640_v18 = vpop.eup %639 }
 0x5ff   :  { %223 = vrot.lane.b32.xlu2 %v640_v18, %s682_s18 }
 0x659   :  { %v224_v19 = vpop.permute.xlu2 %223 }
 0x65a   :  { %v226_v20 = vmul.f32 %v224_v19, %v207_v13 }
 0x65c   :  { %228 = vrot.lane.b32.xlu0 %v226_v20, %s683_s19 }
 0x6ce   :  { %v229_v21 = vpop.permute.xlu0 %228 }
 0x6cf   :  { %592 = vst.msk [vmem:[%s815_s2 + $0x4] sm:$0x3] %vm15_vm0, %v229_v21  ;;  %594 = vmatmul.msk.f32.vlgmr.msra.gmra.mxu3 %vm25_vm1, %v229_v21 }
 0x752   :  { %v254_v23 = vpop.f32.mrf.mxu3 }
 0x753   :  { %v257_v24 = vadd.f32 %v593_v22, %v254_v23 }
 0x755   :  { %641 = vtanh.f32 %v257_v24  ;;  %v595_v26 = vmul.f32 -1.442695, %v257_v24 }
 0x757   :  { %643 = vpow2.f32 %v595_v26 }
 0x75b   :  { %v642_v25 = vpop.eup %641 }
 0x75c   :  { %280 = vrot.lane.b32.xlu1 %v642_v25, %s682_s18 }
 0x75d   :  { %v644_v27 = vpop.eup %643 }
 0x75e   :  { %v261_v28 = vadd.f32 1.0, %v644_v27 }
 0x760   :  { %645 = vrcp.f32 %v261_v28  ;;  %v273_v34 = vand.u32 2147483648, %v261_v28  ;;  %vm267_vm15 = vweird.f32 %v261_v28  ;;  %v271_v35 = vand.u32 2147483647, %v261_v28 }
 0x762   :  { %v274_v37 = vor.u32 1.1754944e-38, %v273_v34  ;;  %vm272_vm3 = vcmp.eq.f32.partialorder %v271_v35, 8.507059e+37 }
 0x766   :  { %v646_v29 = vpop.eup %645 }
 0x767   :  { %v263_v30 = vmul.f32 %v646_v29, %v261_v28  ;;  %vm268_vm14 = vweird.f32 %v646_v29 }
 0x768   :  { %vm269_vm2 = vmor %vm267_vm15, %vm268_vm14 }
 0x769   :  { %v264_v31 = vsub.f32 1.0, %v263_v30 }
 0x76b   :  { %v265_v32 = vmul.f32 %v646_v29, %v264_v31 }
 0x76d   :  { %v266_v33 = vadd.f32 %v646_v29, %v265_v32 }
 0x76f   :  { %v270_v36 = vsel %vm269_vm2, %v646_v29, %v266_v33 }
 0x770   :  { %v275_v39 = vsel %vm272_vm3, %v274_v37, %v270_v36  ;;  %v605_v36 = vld [vmem:[%s814_s0 + $0xc] sm:$0x3] }
 0x771   :  { %v278_v41 = vmul.f32 %v275_v39, %v220_v17 }
 0x7ce   :  { %v281_v38 = vpop.permute.xlu1 %280 }
 0x7cf   :  { %v283_v40 = vmul.f32 %v281_v38, %v275_v39 }
 0x7d1   :  { %285 = vrot.lane.b32.xlu2 %v283_v40, %s683_s19 }
 0x82b   :  { %v286_v42 = vpop.permute.xlu2 %285 }
 0x82c   :  { %v288_v43 = vadd.f32 %v286_v42, %v278_v41 }
 0x82e   :  { %647 = vtanh.f32 %v288_v43 }
 0x834   :  { %v648_v44 = vpop.eup %647 }
 0x835   :  { %291 = vrot.lane.b32.xlu0 %v648_v44, %s682_s18 }
 0x8a7   :  { %v292_v45 = vpop.permute.xlu0 %291 }
 0x8a8   :  { %v294_v46 = vmul.f32 %v292_v45, %v275_v39 }
 0x8aa   :  { %296 = vrot.lane.b32.xlu1 %v294_v46, %s683_s19 }
 0x91c   :  { %v297_v47 = vpop.permute.xlu1 %296 }
 0x91d   :  { %596 = vst.msk [vmem:[%s815_s2 + $0x6] sm:$0x3] %vm15_vm0, %v297_v47  ;;  %598 = vmatmul.msk.f32.vlgmr.msrb.gmra.mxu0 %vm25_vm1, %v297_v47 }
 0x99a   :  { %v322_v49 = vpop.f32.mrf.mxu0 }
 0x99b   :  { %v325_v50 = vadd.f32 %v597_v48, %v322_v49 }
 0x99d   :  { %649 = vtanh.f32 %v325_v50  ;;  %v599_v52 = vmul.f32 -1.442695, %v325_v50 }
 0x99f   :  { %651 = vpow2.f32 %v599_v52 }
 0x9a3   :  { %v650_v51 = vpop.eup %649 }
 0x9a4   :  { %348 = vrot.lane.b32.xlu2 %v650_v51, %s682_s18 }
 0x9a5   :  { %v652_v53 = vpop.eup %651 }
 0x9a6   :  { %v329_v54 = vadd.f32 1.0, %v652_v53 }
 0x9a8   :  { %653 = vrcp.f32 %v329_v54  ;;  %v341_v60 = vand.u32 2147483648, %v329_v54  ;;  %vm335_vm5 = vweird.f32 %v329_v54  ;;  %v339_v61 = vand.u32 2147483647, %v329_v54 }
 0x9aa   :  { %v342_v63 = vor.u32 1.1754944e-38, %v341_v60  ;;  %vm340_vm7 = vcmp.eq.f32.partialorder %v339_v61, 8.507059e+37 }
 0x9ae   :  { %v654_v55 = vpop.eup %653 }
 0x9af   :  { %v331_v56 = vmul.f32 %v654_v55, %v329_v54  ;;  %vm336_vm4 = vweird.f32 %v654_v55 }
 0x9b0   :  { %vm337_vm6 = vmor %vm335_vm5, %vm336_vm4 }
 0x9b1   :  { %v332_v57 = vsub.f32 1.0, %v331_v56 }
 0x9b3   :  { %v333_v58 = vmul.f32 %v654_v55, %v332_v57 }
 0x9b5   :  { %v334_v59 = vadd.f32 %v654_v55, %v333_v58 }
 0x9b7   :  { %v338_v62 = vsel %vm337_vm6, %v654_v55, %v334_v59 }
 0x9b8   :  { %v343_v1 = vsel %vm340_vm7, %v342_v63, %v338_v62  ;;  %v609_v62 = vld [vmem:[%s814_s0 + $0xe] sm:$0x3]  ;;  %s684_s0 = smov 96  }
 0x9b9   :  { %v346_v3 = vmul.f32 %v343_v1, %v288_v43 }
 0x9fe   :  { %v349_v0 = vpop.permute.xlu2 %348 }
 0x9ff   :  { %v351_v2 = vmul.f32 %v349_v0, %v343_v1 }
 0xa01   :  { %353 = vrot.lane.b32.xlu0 %v351_v2, %s683_s19 }
 0xa73   :  { %v354_v4 = vpop.permute.xlu0 %353 }
 0xa74   :  { %v356_v5 = vadd.f32 %v354_v4, %v346_v3 }
 0xa76   :  { %655 = vtanh.f32 %v356_v5 }
 0xa7c   :  { %v656_v6 = vpop.eup %655 }
 0xa7d   :  { %359 = vrot.lane.b32.xlu1 %v656_v6, %s682_s18 }
 0xaef   :  { %v360_v7 = vpop.permute.xlu1 %359 }
 0xaf0   :  { %v362_v8 = vmul.f32 %v360_v7, %v343_v1 }
 0xaf2   :  { %364 = vrot.lane.b32.xlu2 %v362_v8, %s683_s19 }
 0xb4c   :  { %v365_v9 = vpop.permute.xlu2 %364 }
 0xb4d   :  { %600 = vst.msk [vmem:[%s815_s2 + $0x8] sm:$0x3] %vm15_vm0, %v365_v9  ;;  %602 = vmatmul.msk.f32.vlgmr.msrb.gmra.mxu1 %vm25_vm1, %v365_v9 }
 0xbca   :  { %v390_v11 = vpop.f32.mrf.mxu1 }
 0xbcb   :  { %v393_v12 = vadd.f32 %v601_v10, %v390_v11 }
 0xbcd   :  { %657 = vtanh.f32 %v393_v12  ;;  %v603_v14 = vmul.f32 -1.442695, %v393_v12 }
 0xbcf   :  { %659 = vpow2.f32 %v603_v14 }
 0xbd3   :  { %v658_v13 = vpop.eup %657 }
 0xbd4   :  { %416 = vrot.lane.b32.xlu0 %v658_v13, %s682_s18 }
 0xbd5   :  { %v660_v15 = vpop.eup %659 }
 0xbd6   :  { %v397_v16 = vadd.f32 1.0, %v660_v15 }
 0xbd8   :  { %661 = vrcp.f32 %v397_v16  ;;  %v409_v22 = vand.u32 2147483648, %v397_v16  ;;  %vm403_vm9 = vweird.f32 %v397_v16  ;;  %v407_v23 = vand.u32 2147483647, %v397_v16 }
 0xbda   :  { %v410_v25 = vor.u32 1.1754944e-38, %v409_v22  ;;  %vm408_vm11 = vcmp.eq.f32.partialorder %v407_v23, 8.507059e+37 }
 0xbde   :  { %v662_v17 = vpop.eup %661 }
 0xbdf   :  { %v399_v18 = vmul.f32 %v662_v17, %v397_v16  ;;  %vm404_vm8 = vweird.f32 %v662_v17 }
 0xbe0   :  { %vm405_vm10 = vmor %vm403_vm9, %vm404_vm8 }
 0xbe1   :  { %v400_v19 = vsub.f32 1.0, %v399_v18 }
 0xbe3   :  { %v401_v20 = vmul.f32 %v662_v17, %v400_v19 }
 0xbe5   :  { %v402_v21 = vadd.f32 %v662_v17, %v401_v20 }
 0xbe7   :  { %v406_v24 = vsel %vm405_vm10, %v662_v17, %v402_v21 }
 0xbe8   :  { %v411_v27 = vsel %vm408_vm11, %v410_v25, %v406_v24 }
 0xbe9   :  { %v414_v29 = vmul.f32 %v411_v27, %v356_v5 }
 0xc46   :  { %v417_v26 = vpop.permute.xlu0 %416 }
 0xc47   :  { %v419_v28 = vmul.f32 %v417_v26, %v411_v27 }
 0xc49   :  { %421 = vrot.lane.b32.xlu1 %v419_v28, %s683_s19 }
 0xcbb   :  { %v422_v30 = vpop.permute.xlu1 %421 }
 0xcbc   :  { %v424_v31 = vadd.f32 %v422_v30, %v414_v29 }
 0xcbe   :  { %663 = vtanh.f32 %v424_v31 }
 0xcc4   :  { %v664_v32 = vpop.eup %663 }
 0xcc5   :  { %427 = vrot.lane.b32.xlu2 %v664_v32, %s682_s18 }
 0xd1f   :  { %v428_v33 = vpop.permute.xlu2 %427 }
 0xd20   :  { %v430_v34 = vmul.f32 %v428_v33, %v411_v27 }
 0xd22   :  { %432 = vrot.lane.b32.xlu0 %v430_v34, %s683_s19 }
 0xd94   :  { %v433_v35 = vpop.permute.xlu0 %432 }
 0xd95   :  { %604 = vst.msk [vmem:[%s815_s2 + $0xa] sm:$0x3] %vm15_vm0, %v433_v35  ;;  %606 = vmatmul.msk.f32.vlgmr.msrb.gmra.mxu2 %vm25_vm1, %v433_v35 }
 0xe18   :  { %v458_v37 = vpop.f32.mrf.mxu2 }
 0xe19   :  { %v461_v38 = vadd.f32 %v605_v36, %v458_v37 }
 0xe1b   :  { %665 = vtanh.f32 %v461_v38  ;;  %v607_v40 = vmul.f32 -1.442695, %v461_v38 }
 0xe1d   :  { %667 = vpow2.f32 %v607_v40 }
 0xe21   :  { %v666_v39 = vpop.eup %665 }
 0xe22   :  { %484 = vrot.lane.b32.xlu1 %v666_v39, %s682_s18 }
 0xe23   :  { %v668_v41 = vpop.eup %667 }
 0xe24   :  { %v465_v42 = vadd.f32 1.0, %v668_v41 }
 0xe26   :  { %669 = vrcp.f32 %v465_v42  ;;  %v477_v48 = vand.u32 2147483648, %v465_v42  ;;  %vm471_vm13 = vweird.f32 %v465_v42  ;;  %v475_v49 = vand.u32 2147483647, %v465_v42 }
 0xe28   :  { %v478_v51 = vor.u32 1.1754944e-38, %v477_v48  ;;  %vm476_vm15 = vcmp.eq.f32.partialorder %v475_v49, 8.507059e+37 }
 0xe2c   :  { %v670_v43 = vpop.eup %669 }
 0xe2d   :  { %v467_v44 = vmul.f32 %v670_v43, %v465_v42  ;;  %vm472_vm12 = vweird.f32 %v670_v43 }
 0xe2e   :  { %vm473_vm14 = vmor %vm471_vm13, %vm472_vm12 }
 0xe2f   :  { %v468_v45 = vsub.f32 1.0, %v467_v44 }
 0xe31   :  { %v469_v46 = vmul.f32 %v670_v43, %v468_v45 }
 0xe33   :  { %v470_v47 = vadd.f32 %v670_v43, %v469_v46 }
 0xe35   :  { %v474_v50 = vsel %vm473_vm14, %v670_v43, %v470_v47 }
 0xe36   :  { %v479_v53 = vsel %vm476_vm15, %v478_v51, %v474_v50 }
 0xe37   :  { %v482_v55 = vmul.f32 %v479_v53, %v424_v31 }
 0xe94   :  { %v485_v52 = vpop.permute.xlu1 %484 }
 0xe95   :  { %v487_v54 = vmul.f32 %v485_v52, %v479_v53 }
 0xe97   :  { %489 = vrot.lane.b32.xlu2 %v487_v54, %s683_s19 }
 0xef1   :  { %v490_v56 = vpop.permute.xlu2 %489 }
 0xef2   :  { %v492_v57 = vadd.f32 %v490_v56, %v482_v55 }
 0xef4   :  { %671 = vtanh.f32 %v492_v57 }
 0xefa   :  { %v672_v58 = vpop.eup %671 }
 0xefb   :  { %495 = vrot.lane.b32.xlu0 %v672_v58, %s682_s18 }
 0xf6d   :  { %v496_v59 = vpop.permute.xlu0 %495 }
 0xf6e   :  { %v498_v60 = vmul.f32 %v496_v59, %v479_v53 }
 0xf70   :  { %500 = vrot.lane.b32.xlu1 %v498_v60, %s683_s19 }
 0xfe2   :  { %v501_v61 = vpop.permute.xlu1 %500 }
 0xfe3   :  { %608 = vst.msk [vmem:[%s815_s2 + $0xc] sm:$0x3] %vm15_vm0, %v501_v61  ;;  %610 = vmatmul.msk.f32.vlgmr.msrb.gmra.mxu3 %vm25_vm1, %v501_v61 }
0x1066   :  { %v526_v63 = vpop.f32.mrf.mxu3 }
0x1067   :  { %v529_v0 = vadd.f32 %v609_v62, %v526_v63 }
0x1069   :  { %673 = vtanh.f32 %v529_v0  ;;  %v611_v2 = vmul.f32 -1.442695, %v529_v0 }
0x106b   :  { %675 = vpow2.f32 %v611_v2 }
0x106f   :  { %v674_v1 = vpop.eup %673 }
0x1070   :  { %552 = vrot.lane.b32.xlu2 %v674_v1, %s682_s18 }
0x1071   :  { %v676_v3 = vpop.eup %675 }
0x1072   :  { %v533_v4 = vadd.f32 1.0, %v676_v3 }
0x1074   :  { %677 = vrcp.f32 %v533_v4  ;;  %v545_v10 = vand.u32 2147483648, %v533_v4  ;;  %vm539_vm2 = vweird.f32 %v533_v4  ;;  %v543_v11 = vand.u32 2147483647, %v533_v4 }
0x1076   :  { %v546_v13 = vor.u32 1.1754944e-38, %v545_v10  ;;  %vm544_vm4 = vcmp.eq.f32.partialorder %v543_v11, 8.507059e+37 }
0x107a   :  { %v678_v5 = vpop.eup %677 }
0x107b   :  { %v535_v6 = vmul.f32 %v678_v5, %v533_v4  ;;  %vm540_vm1 = vweird.f32 %v678_v5 }
0x107c   :  { %vm541_vm3 = vmor %vm539_vm2, %vm540_vm1 }
0x107d   :  { %v536_v7 = vsub.f32 1.0, %v535_v6 }
0x107f   :  { %v537_v8 = vmul.f32 %v678_v5, %v536_v7 }
0x1081   :  { %v538_v9 = vadd.f32 %v678_v5, %v537_v8 }
0x1083   :  { %v542_v12 = vsel %vm541_vm3, %v678_v5, %v538_v9 }
0x1084   :  { %v547_v15 = vsel %vm544_vm4, %v546_v13, %v542_v12 }
0x1085   :  { %v550_v17 = vmul.f32 %v547_v15, %v492_v57 }
0x10ca   :  { %v553_v14 = vpop.permute.xlu2 %552 }
0x10cb   :  { %v555_v16 = vmul.f32 %v553_v14, %v547_v15 }
0x10cd   :  { %557 = vrot.lane.b32.xlu0 %v555_v16, %s683_s19 }
0x113f   :  { %v558_v18 = vpop.permute.xlu0 %557 }
0x1140   :  { %v560_v19 = vadd.f32 %v558_v18, %v550_v17 }
0x1142   :  { %679 = vtanh.f32 %v560_v19  ;;  %575 = vrot.lane.b32.xlu0 %v560_v19, %s684_s0 }
0x1148   :  { %v680_v20 = vpop.eup %679 }
0x1149   :  { %563 = vrot.lane.b32.xlu1 %v680_v20, %s682_s18 }
0x11b4   :  { %v576_v21 = vpop.permute.xlu0 %575 }
0x11b5   :  { %578 = vst.msk [vmem:[#allocation3] sm:$0x3] %vm15_vm0, %v576_v21 }
0x11bb   :  { %v564_v22 = vpop.permute.xlu1 %563 }
0x11bc   :  { %v566_v23 = vmul.f32 %v564_v22, %v547_v15 }
0x11be   :  { %568 = vrot.lane.b32.xlu2 %v566_v23, %s683_s19 }
0x1218   :  { %v569_v24 = vpop.permute.xlu2 %568 }
0x1219   :  { %612 = vst.msk [vmem:[%s815_s2 + $0xe] sm:$0x3] %vm15_vm0, %v569_v24 }
0x121a   :  { %573 = vst.msk [vmem:[#allocation2] sm:$0x3] %vm15_vm0, %v569_v24 }

</bundles_post_ra>
